<compile_context>
chip_gen: v5e
topology: v5e:2x2
jax: 0.10.0
libtpu: 0.0.40
codegen_flags: <defaults>
</compile_context>

<pallas_src>
import functools
import math

import jax
import jax.numpy as jnp
from jax import lax
from jax.experimental import pallas as pl
from jax.experimental.pallas import tpu as pltpu


def _tensorcores_per_chip() -> int:
    """Best-effort TensorCores-per-device count.

    v7x (and v4/v5p megacore) expose 2 TCs per device; v5e/v6e expose 1.
    Unknown -> 1 (always correct, just no cross-core split).
    """
    try:
        kind = jax.devices()[0].device_kind.lower()
    except Exception:
        return 1
    if any(tag in kind for tag in ("v7", "v4", "v5p")):
        return 2
    return 1


def _head_kernel(x_ref, w_ref, o_ref, *, head_size):
    # x_ref : (bb, T, C)   w_ref : (C, Wp) with k|q|v packed in the first 3*H
    # columns (zero elsewhere)   o_ref : (bb, T, H)
    bb, t, c = x_ref.shape
    h = head_size

    x = x_ref[...]                    # keep input dtype for the MXU feed
    w = w_ref[...]

    # Fused k/q/v projection: one MXU matmul over all bb*T rows, f32 accumulate.
    # The weight is pre-transposed and zero-padded along the embed axis, so
    # using all C columns of x is identical to slicing x[:, :, :embed_dim].
    kqv = jnp.dot(x.reshape(bb * t, c), w,
                  preferred_element_type=jnp.float32)            # (bb*T, Wp)
    kqv = kqv.reshape(bb, t, w.shape[-1])

    # Static in-vreg slices (single 128-lane slot; cheap lane selects).
    k = kqv[:, :, 0 * h:1 * h]
    q = kqv[:, :, 1 * h:2 * h]
    v = kqv[:, :, 2 * h:3 * h]

    # Scaled attention scores, contracting the head axis directly (no .T).
    # Matches PyTorch's k.shape[-1] ** -0.5.
    scale = jnp.float32(h) ** jnp.float32(-0.5)
    wei = jnp.einsum('bth,bsh->bts', q, k,
                     preferred_element_type=jnp.float32) * scale  # (bb, T, T)

    # Causal mask from a single (T, T) iota pair, broadcast over batch.
    row = lax.broadcasted_iota(jnp.int32, (t, t), 0)
    col = lax.broadcasted_iota(jnp.int32, (t, t), 1)
    causal = (row >= col)[None, :, :]
    wei = jnp.where(causal, wei, -jnp.inf)

    # Softmax in f32; exact reciprocal keeps the 1e-5 check
    # (pl.reciprocal(..., approx=True) is a free EUP win if tolerance allows).
    m = jnp.max(wei, axis=-1, keepdims=True)
    p = jnp.exp(wei - m)
    denom = jnp.sum(p, axis=-1, keepdims=True)
    p = p * pl.reciprocal(denom, approx=False)

    # dropout p = 0.0 -> identity (no-op)

    out = jnp.einsum('bts,bsh->bth', p.astype(v.dtype), v,
                     preferred_element_type=jnp.float32)          # (bb, T, H)
    o_ref[...] = out.astype(o_ref.dtype)


def prepare_head_params(key_w, query_w, value_w, i, choices, x_feature_dim,
                        dtype=None):
    """One-time supernet slicing + fusion + packing of the head weights.

    Returns (w_fused, head_size) where w_fused is (C, Wp), Wp = lane-rounded
    3*head_size (>=128):
      columns [0, H)      -> key weight (transposed)
      columns [H, 2H)     -> query weight
      columns [2H, 3H)    -> value weight
    Rows >= embed_dim and columns >= 3H are zero.  Build this ONCE per
    (i, choices) -- not per forward call.
    """
    head_size = choices['head_size'][i]
    embed_dim = choices['embed_dim']
    # bias=False in the module constructor -> biases are None regardless of
    # the choice strings.
    # TODO(synk): bias_head_* == 'True' would index a nonexistent bias in the
    # reference module (bias=False), so bias support is intentionally omitted.

    w_pad = max(128, ((3 * head_size + 127) // 128) * 128)   # lane-dense slot
    w_dtype = dtype if dtype is not None else key_w.dtype

    kw = key_w[:head_size, :embed_dim].T.astype(w_dtype)     # (E, H)
    qw = query_w[:head_size, :embed_dim].T.astype(w_dtype)
    vw = value_w[:head_size, :embed_dim].T.astype(w_dtype)

    w = jnp.zeros((x_feature_dim, w_pad), dtype=w_dtype)
    w = w.at[:embed_dim, 0 * head_size:1 * head_size].set(kw)
    w = w.at[:embed_dim, 1 * head_size:2 * head_size].set(qw)
    w = w.at[:embed_dim, 2 * head_size:3 * head_size].set(vw)
    return w, head_size


def head_forward(x, w_fused, head_size):
    """Pallas equivalent of Head.forward(x, i, choices) given prepared weights.

    x        : (B, T, C) -- C must equal w_fused.shape[0]
    w_fused  : (C, Wp) from prepare_head_params
    returns  : (B, T, head_size)  (no post-kernel slice)
    """
    B, T, C = x.shape
    assert w_fused.shape[0] == C

    out_dtype = x.dtype
    if x.dtype != w_fused.dtype:          # e.g. bf16 MXU operands on v6e/v7x
        x = x.astype(w_fused.dtype)

    # Single grid step on single-TC chips (v5e/v6e); 2-way batch split only
    # when a second TensorCore exists (v7x / megacore).
    n_tc = _tensorcores_per_chip()
    n_blocks = 2 if (n_tc >= 2 and B >= 2 and B % 2 == 0) else 1
    bb = B // n_blocks
    w_pad = w_fused.shape[1]

    kernel = functools.partial(_head_kernel, head_size=head_size)

    out = pl.pallas_call(
        kernel,
        out_shape=jax.ShapeDtypeStruct((B, T, head_size), out_dtype),
        grid_spec=pltpu.PrefetchScalarGridSpec(
            num_scalar_prefetch=0,
            grid=(n_blocks,),
            in_specs=[
                pl.BlockSpec((bb, T, C), lambda b: (b, 0, 0)),
                pl.BlockSpec((C, w_pad), lambda b: (0, 0)),   # resident weight
            ],
            out_specs=pl.BlockSpec((bb, T, head_size), lambda b: (b, 0, 0)),
        ),
        compiler_params=pltpu.CompilerParams(
            dimension_semantics=(
                ("parallel",) if n_blocks > 1 else ("arbitrary",))),
    )(x, w_fused)
    return out


def head_forward_ref(x, key_w, query_w, value_w, i, choices):
    """Pure-JAX reference mirroring the PyTorch forward."""
    head_size = choices['head_size'][i]
    embed_dim = choices['embed_dim']
    x_e = x[:, :, :embed_dim]
    kw = key_w[:head_size, :embed_dim]
    qw = query_w[:head_size, :embed_dim]
    vw = value_w[:head_size, :embed_dim]
    k = jnp.einsum('bte,he->bth', x_e, kw)
    q = jnp.einsum('bte,he->bth', x_e, qw)
    v = jnp.einsum('bte,he->bth', x_e, vw)
    wei = jnp.einsum('bth,bsh->bts', q, k) * (head_size ** -0.5)
    T = x.shape[1]
    tril = jnp.tril(jnp.ones((T, T), dtype=bool))
    wei = jnp.where(tril, wei, -jnp.inf)
    wei = jax.nn.softmax(wei, axis=-1)
    return jnp.einsum('bts,bsh->bth', wei, v)


if __name__ == "__main__":
    # small shapes consistent with the module
    n_embd = 32          # full embedding dim of the supernet Linear
    head_size_full = 16  # full head size of the supernet Linear
    B, T = 2, 8          # T <= block_size (64)

    key = jax.random.PRNGKey(0)
    kx, kk, kq, kv = jax.random.split(key, 4)

    x = jax.random.normal(kx, (B, T, n_embd), dtype=jnp.float32)
    bound = 1.0 / math.sqrt(n_embd)
    key_w = jax.random.uniform(kk, (head_size_full, n_embd), jnp.float32, -bound, bound)
    query_w = jax.random.uniform(kq, (head_size_full, n_embd), jnp.float32, -bound, bound)
    value_w = jax.random.uniform(kv, (head_size_full, n_embd), jnp.float32, -bound, bound)

    choices = {
        'embed_dim': 24,
        'head_size': [12, 16],
        'bias_head_k': ['False', 'False'],
        'bias_head_q': ['False', 'False'],
        'bias_head_v': ['False', 'False'],
    }
    i = 0

    # One-time weight prep (hoisted out of the per-token path).  Use
    # dtype=jnp.bfloat16 here for the v6e/v7x MXU feed if tolerance allows
    # (projection operands narrow; softmax/attn@v stay f32).
    w_fused, H = prepare_head_params(
        key_w, query_w, value_w, i, choices, x_feature_dim=n_embd,
        dtype=jnp.float32)

    out = head_forward(x, w_fused, H)
    out = jax.block_until_ready(out)

    ref = head_forward_ref(x, key_w, query_w, value_w, i, choices)
    assert out.shape == (B, T, choices['head_size'][i])
    assert jnp.allclose(out, ref, atol=1e-5, rtol=1e-5), "mismatch vs reference"

    print("KERNEL_OK")
</pallas_src>

<mosaic_0001>
module attributes {stable_mosaic.version = 11 : i64} {
  func.func @_head_kernel(%arg0: i32, %arg1: memref<2x8x32xf32, #tpu.memory_space<vmem>>, %arg2: memref<32x128xf32, #tpu.memory_space<vmem>>, %arg3: memref<2x8x12xf32, #tpu.memory_space<vmem>>) attributes {dimension_semantics = [#tpu.dimension_semantics<arbitrary>], iteration_bounds = array<i64: 1>, scalar_prefetch = 0 : i64, scratch_operands = 0 : i64, tpu.core_type = #tpu.core_type<tc>, window_params = [{transform_indices = @transform_0, window_bounds = array<i64: 2, 8, 32>}, {pipeline_mode = #tpu.pipeline_mode<synchronous>, transform_indices = @transform_1, window_bounds = array<i64: 32, 128>}, {transform_indices = @transform_2, window_bounds = array<i64: 2, 8, 12>}]} {
    %c0 = arith.constant 0 : index
    %c0_0 = arith.constant 0 : index
    %c0_1 = arith.constant 0 : index
    %0 = vector.load %arg1[%c0, %c0_0, %c0_1] : memref<2x8x32xf32, #tpu.memory_space<vmem>>, vector<2x8x32xf32>
    %c0_2 = arith.constant 0 : index
    %c0_3 = arith.constant 0 : index
    %1 = vector.load %arg2[%c0_2, %c0_3] : memref<32x128xf32, #tpu.memory_space<vmem>>, vector<32x128xf32>
    %2 = vector.shape_cast %0 : vector<2x8x32xf32> to vector<16x32xf32>
    %cst = arith.constant dense<0.000000e+00> : vector<16x128xf32>
    %3 = tpu.matmul %2, %1, %cst {dimension_numbers = #tpu.dot_dimension_numbers<[1], [0], [0], [1], [0, 0, 1, 1], [], []>} : vector<16x32xf32>, vector<32x128xf32>, vector<16x128xf32> -> vector<16x128xf32>
    %4 = vector.shape_cast %3 : vector<16x128xf32> to vector<2x8x128xf32>
    %5 = vector.extract_strided_slice %4 {offsets = [0, 0, 0], sizes = [2, 8, 12], strides = [1, 1, 1]} : vector<2x8x128xf32> to vector<2x8x12xf32>
    %6 = vector.extract_strided_slice %4 {offsets = [0, 0, 12], sizes = [2, 8, 12], strides = [1, 1, 1]} : vector<2x8x128xf32> to vector<2x8x12xf32>
    %7 = vector.extract_strided_slice %4 {offsets = [0, 0, 24], sizes = [2, 8, 12], strides = [1, 1, 1]} : vector<2x8x128xf32> to vector<2x8x12xf32>
    %cst_4 = arith.constant 1.200000e+01 : f32
    %cst_5 = arith.constant -5.000000e-01 : f32
    %8 = math.powf %cst_4, %cst_5 : f32
    "tpu.trace_start"() <{level = 10 : i32, message = "bth,bsh->bts"}> : () -> ()
    %cst_6 = arith.constant dense<0.000000e+00> : vector<2x8x8xf32>
    %9 = tpu.matmul %6, %5, %cst_6 {dimension_numbers = #tpu.dot_dimension_numbers<[2], [2], [1], [1], [0, 0, 0, 1, 1, 1], [0], [0]>} : vector<2x8x12xf32>, vector<2x8x12xf32>, vector<2x8x8xf32> -> vector<2x8x8xf32>
    "tpu.trace_stop"() : () -> ()
    %10 = vector.broadcast %8 : f32 to vector<2x8x8xf32>
    %11 = arith.mulf %9, %10 : vector<2x8x8xf32>
    %12 = tpu.iota {dimensions = array<i32: 0>} : vector<8x8xi32>
    %13 = tpu.iota {dimensions = array<i32: 1>} : vector<8x8xi32>
    %14 = arith.cmpi sge, %12, %13 : vector<8x8xi32>
    %15 = vector.shape_cast %14 : vector<8x8xi1> to vector<1x8x8xi1>
    %cst_7 = arith.constant 0xFF800000 : f32
    %16 = vector.shape_cast %15 : vector<1x8x8xi1> to vector<1x8x8xi1>
    %17 = vector.broadcast %16 : vector<1x8x8xi1> to vector<2x8x8xi1>
    %18 = vector.broadcast %cst_7 : f32 to vector<2x8x8xf32>
    %19 = arith.select %17, %11, %18 : vector<2x8x8xi1>, vector<2x8x8xf32>
    %cst_8 = arith.constant dense<0xFF800000> : vector<2x8xf32>
    %20 = vector.multi_reduction <maximumf>, %19, %cst_8 [2] : vector<2x8x8xf32> to vector<2x8xf32>
    %21 = vector.shape_cast %20 : vector<2x8xf32> to vector<2x8x1xf32>
    %22 = vector.broadcast %21 : vector<2x8x1xf32> to vector<2x8x8xf32>
    %23 = arith.subf %19, %22 : vector<2x8x8xf32>
    %24 = math.exp %23 : vector<2x8x8xf32>
    %cst_9 = arith.constant dense<0.000000e+00> : vector<2x8xf32>
    %25 = vector.multi_reduction <add>, %24, %cst_9 [2] : vector<2x8x8xf32> to vector<2x8xf32>
    %26 = vector.shape_cast %25 : vector<2x8xf32> to vector<2x8x1xf32>
    %27 = tpu.reciprocal %26 : vector<2x8x1xf32> -> vector<2x8x1xf32>
    %28 = vector.broadcast %27 : vector<2x8x1xf32> to vector<2x8x8xf32>
    %29 = arith.mulf %24, %28 : vector<2x8x8xf32>
    "tpu.trace_start"() <{level = 10 : i32, message = "bts,bsh->bth"}> : () -> ()
    %cst_10 = arith.constant dense<0.000000e+00> : vector<2x8x12xf32>
    %30 = tpu.matmul %29, %7, %cst_10 {dimension_numbers = #tpu.dot_dimension_numbers<[2], [1], [1], [2], [0, 0, 0, 1, 1, 2], [0], [0]>} : vector<2x8x8xf32>, vector<2x8x12xf32>, vector<2x8x12xf32> -> vector<2x8x12xf32>
    "tpu.trace_stop"() : () -> ()
    %c0_11 = arith.constant 0 : index
    %c0_12 = arith.constant 0 : index
    %c0_13 = arith.constant 0 : index
    %31 = vector.load %arg3[%c0_11, %c0_12, %c0_13] : memref<2x8x12xf32, #tpu.memory_space<vmem>>, vector<2x8x12xf32>
    tpu.vector_store %arg3[%c0_11, %c0_12, %c0_13], %30 {strides = array<i32>} : memref<2x8x12xf32, #tpu.memory_space<vmem>>, vector<2x8x12xf32>,
    return
  }
  func.func @transform_0(%arg0: i32) -> (i32, i32, i32) {
    %c0_i32 = arith.constant 0 : i32
    %c0_i32_0 = arith.constant 0 : i32
    %c0_i32_1 = arith.constant 0 : i32
    return %arg0, %c0_i32, %c0_i32_0 : i32, i32, i32
  }
  func.func @transform_1(%arg0: i32) -> (i32, i32) {
    %c0_i32 = arith.constant 0 : i32
    %c0_i32_0 = arith.constant 0 : i32
    %c0_i32_1 = arith.constant 0 : i32
    return %c0_i32, %c0_i32_0 : i32, i32
  }
  func.func @transform_2(%arg0: i32) -> (i32, i32, i32) {
    %c0_i32 = arith.constant 0 : i32
    %c0_i32_0 = arith.constant 0 : i32
    %c0_i32_1 = arith.constant 0 : i32
    return %arg0, %c0_i32, %c0_i32_0 : i32, i32, i32
  }
}

</mosaic_0001>

<bundles_post_ra>
// kernel: tpu_custom_call.1
= control target key start
LH: loop header
LB: loop body
LE: loop exit
PB: predicated region body
PF: predicated region fallthrough
CT: control target
= control target key end

     0   :  { %7 = vsyncpa [#allocation3], 0  ;;  %s422_s0 = inlined_call_operand.hbm [shape: f32[2,8,32], index: 0, kind: input, shape index: {}]   ;;  %s423_s1 = inlined_call_operand.hbm [shape: f32[32,128], index: 1, kind: input, shape index: {}]   ;;  %s424_s2 = inlined_call_operand.hbm [shape: f32[2,8,12], index: 2, kind: output, shape index: {}]  }
   0x1   :  { %8 = vsyncpa [#allocation6], 0 }
   0x2   :  { %9 = vsyncpa [#allocation4], 0  ;;  %s14_s11 = sshll.u32 %s422_s0, 4  ;;  %s370_s12 = smov [#allocation2]   ;;  %s15_s11 = int_to_ptr.hbm [resolvable:$true] %s14_s11 }
   0x3   :  { %s16_s13 = sshll.u32 %s370_s12, 4  ;;  %s27_s16 = sshll.u32 %s423_s1, 4  ;;  %s17_s13 = int_to_ptr.vmem [resolvable:$true] %s16_s13  ;;  %s28_s16 = int_to_ptr.hbm [resolvable:$true] %s27_s16 }
   0x4   :  { %s371_s17 = smov 128   ;;  %s372_s18 = smov 8  }
   0x5   :  { %22 = dma.hbm_to_vmem [thread:$0]  %s15_s11, 256, %s17_s13, [#allocation3], %s371_s17, %s371_s17, %s372_s18  }
   0x6   :  { %s373_s19 = smov [#allocation5]  }
   0x7   :  { %s29_s20 = sshll.u32 %s373_s19, 4  ;;  %s30_s20 = int_to_ptr.vmem [resolvable:$true] %s29_s20 }
   0x8   :  { %35 = dma.hbm_to_vmem [thread:$0]  %s28_s16, 512, %s30_s20, [#allocation6], %s371_s17, %s371_s17, %s372_s18  }
   0x9   :  { %364 = dma.done.wait [#allocation3], 256  }
   0xa   :  { %365 = vsyncadd [#allocation3], 4294967040 }
   0xb   :  { %366 = dma.done.wait [#allocation6], 512  }
   0xc   :  { %367 = vsyncadd [#allocation6], 4294966784  ;;  %v49_v0 = vld [vmem:[#allocation5 + $0x18] sm:$0xff]  ;;  %v48_v1 = vld [vmem:[#allocation5 + $0x10] sm:$0xff]  ;;  %vm50_vm0 = vcmask 261120   ;;  %vm83_vm1 = vcmask 97280   ;;  %v137_v11 = vlaneseq }
   0xd   :  { %69 = vmatpush.msra.mxu0 %v49_v0  ;;  %v47_v2 = vld [vmem:[#allocation5 + $0x8] sm:$0xff]  ;;  %v46_v3 = vld [vmem:[#allocation5] sm:$0xff]  ;;  %v44_v4 = vld [vmem:[#allocation2] sm:$0xff]  ;;  %s374_s0 = smov 116   ;;  %s375_s1 = smov 104   ;;  %vm146_vm3 = vcmask 64512  }
   0xe   :  { %v45_v5 = vld [vmem:[#allocation2 + $0x8] sm:$0xff]  ;;  %v138_v12 = vshrl.u32 %v137_v11, 7  ;;  %v140_v13 = vand.u32 127, %v137_v11  ;;  %s376_s21 = smov [#allocation7]   ;;  %s255_s25 = sshll.u32 %s424_s2, 4  ;;  %s256_s25 = int_to_ptr.hbm [resolvable:$true] %s255_s25 }
   0xf   :  { %70 = vmatpush.msra.mxu0 %v48_v1  ;;  %s253_s22 = sshll.u32 %s376_s21, 4  ;;  %s254_s22 = int_to_ptr.vmem [resolvable:$true] %s253_s22 }
  0x10   :  { %vm141_vm2 = vcmp.ge.s32.totalorder %v138_v12, %v140_v13 }
  0x11   :  { %71 = vmatpush.msra.mxu0 %v47_v2 }
  0x13   :  { %72 = vmatpush.msra.mxu0 %v46_v3 }
  0x14   :  { %269 = vmatmul.msk.f32.vlgmr.msra.gmra.mxu0 %vm50_vm0, %v44_v4 }
  0x1c   :  { %270 = vmatmul.msk.f32.gmra.mxu0 %vm50_vm0, %v45_v5 }
  0x91   :  { %v74_v6 = vpop.f32.mrf.mxu0 }
  0x92   :  { %81 = vrot.lane.b32.xlu0 %v74_v6, %s374_s0  ;;  %271 = vmatpush.xpose.msk.msra.mxu1 %vm83_vm1, %v74_v6 }
  0x99   :  { %v77_v7 = vpop.f32.mrf.mxu0 }
  0x9a   :  { %109 = vrot.lane.b32.xlu0 %v77_v7, %s374_s0  ;;  %273 = vmatpush.xpose.msk.msra.mxu2 %vm83_vm1, %v77_v7 }
  0xa2   :  { %195 = vrot.lane.b32.xlu0 %v74_v6, %s375_s1 }
 0x104   :  { %v82_v8 = vpop.permute.xlu0 %81 }
 0x105   :  { %272 = vmatmul.msk.f32.vlgmr.msra.gmra.mxu1 %vm83_vm1, %v82_v8 }
 0x10c   :  { %v110_v9 = vpop.permute.xlu0 %109 }
 0x10d   :  { %274 = vmatmul.msk.f32.vlgmr.msra.gmra.mxu2 %vm83_vm1, %v110_v9 }
 0x114   :  { %v196_v10 = vpop.permute.xlu0 %195 }
 0x115   :  { %216 = vmatpush.msra.mxu3 %v196_v10 }
 0x182   :  { %v105_v14 = vpop.f32.mrf.mxu1 }
 0x183   :  { %v135_v15 = vmul.f32 0.28867513, %v105_v14 }
 0x185   :  { %v144_v16 = vsel %vm141_vm2, %v135_v15, -inf }
 0x186   :  { %v147_v17 = vsel %vm146_vm3, %v144_v16, -inf }
 0x187   :  { %148 = vmax.xlane.f32.xlu1 %v147_v17 }
 0x190   :  { %v132_v18 = vpop.f32.mrf.mxu2 }
 0x191   :  { %v136_v19 = vmul.f32 0.28867513, %v132_v18 }
 0x193   :  { %v145_v20 = vsel %vm141_vm2, %v136_v19, -inf }
 0x194   :  { %v150_v21 = vsel %vm146_vm3, %v145_v20, -inf }
 0x195   :  { %151 = vmax.xlane.f32.xlu1 %v150_v21 }
 0x1ae   :  { %221 = vrot.lane.b32.xlu1 %v77_v7, %s375_s1 }
 0x1fa   :  { %v149_v22 = vpop.xlane.xlu1 %148 }
 0x1fb   :  { %v153_v23 = vsub.f32 %v144_v16, %v149_v22 }
 0x1fd   :  { %v155_v24 = vmul.f32 1.442695, %v153_v23 }
 0x1ff   :  { %284 = vpow2.f32 %v155_v24 }
 0x205   :  { %v285_v25 = vpop.eup %284 }
 0x206   :  { %v159_v26 = vsel %vm146_vm3, %v285_v25, 0.0 }
 0x207   :  { %160 = vadd.xlane.f32.xlu2 %v159_v26 }
 0x208   :  { %v152_v27 = vpop.xlane.xlu1 %151 }
 0x209   :  { %v154_v28 = vsub.f32 %v145_v20, %v152_v27 }
 0x20b   :  { %v157_v29 = vmul.f32 1.442695, %v154_v28 }
 0x20d   :  { %286 = vpow2.f32 %v157_v29 }
 0x213   :  { %v287_v30 = vpop.eup %286 }
 0x214   :  { %v162_v31 = vsel %vm146_vm3, %v287_v30, 0.0 }
 0x215   :  { %163 = vadd.xlane.f32.xlu2 %v162_v31 }
 0x220   :  { %v222_v32 = vpop.permute.xlu1 %221 }
 0x221   :  { %242 = vmatpush.msrb.mxu3 %v222_v32 }
 0x27a   :  { %v161_v33 = vpop.xlane.xlu2 %160 }
 0x27b   :  { %288 = vrcp.f32 %v161_v33  ;;  %v176_v37 = vand.u32 2147483648, %v161_v33  ;;  %v174_v39 = vand.u32 2147483647, %v161_v33  ;;  %vm170_vm5 = vweird.f32 %v161_v33 }
 0x27d   :  { %v177_v42 = vor.u32 1.1754944e-38, %v176_v37  ;;  %vm175_vm7 = vcmp.eq.f32.partialorder %v174_v39, 8.507059e+37 }
 0x281   :  { %v289_v34 = vpop.eup %288 }
 0x282   :  { %v166_v35 = vmul.f32 %v289_v34, %v161_v33  ;;  %vm171_vm4 = vweird.f32 %v289_v34 }
 0x283   :  { %vm172_vm6 = vmor %vm170_vm5, %vm171_vm4 }
 0x284   :  { %v167_v36 = vsub.f32 1.0, %v166_v35 }
 0x286   :  { %v168_v38 = vmul.f32 %v289_v34, %v167_v36 }
 0x288   :  { %v164_v40 = vpop.xlane.xlu2 %163  ;;  %v169_v41 = vadd.f32 %v289_v34, %v168_v38 }
 0x289   :  { %290 = vrcp.f32 %v164_v40  ;;  %v190_v49 = vand.u32 2147483648, %v164_v40  ;;  %v188_v51 = vand.u32 2147483647, %v164_v40  ;;  %vm184_vm9 = vweird.f32 %v164_v40 }
 0x28a   :  { %v173_v43 = vsel %vm172_vm6, %v289_v34, %v169_v41 }
 0x28b   :  { %v178_v44 = vsel %vm175_vm7, %v177_v42, %v173_v43  ;;  %v191_v53 = vor.u32 1.1754944e-38, %v190_v49  ;;  %vm189_vm11 = vcmp.eq.f32.partialorder %v188_v51, 8.507059e+37 }
 0x28c   :  { %v193_v45 = vmul.f32 %v285_v25, %v178_v44 }
 0x28e   :  { %275 = vmatmul.msk.f32.vlgmr.msra.gmra.mxu3 %vm146_vm3, %v193_v45 }
 0x28f   :  { %v291_v46 = vpop.eup %290 }
 0x290   :  { %v180_v47 = vmul.f32 %v291_v46, %v164_v40  ;;  %vm185_vm8 = vweird.f32 %v291_v46 }
 0x291   :  { %vm186_vm10 = vmor %vm184_vm9, %vm185_vm8 }
 0x292   :  { %v181_v48 = vsub.f32 1.0, %v180_v47 }
 0x294   :  { %v182_v50 = vmul.f32 %v291_v46, %v181_v48 }
 0x296   :  { %v183_v52 = vadd.f32 %v291_v46, %v182_v50 }
 0x298   :  { %v187_v54 = vsel %vm186_vm10, %v291_v46, %v183_v52 }
 0x299   :  { %v192_v55 = vsel %vm189_vm11, %v191_v53, %v187_v54 }
 0x29a   :  { %v194_v56 = vmul.f32 %v287_v30, %v192_v55 }
 0x29c   :  { %276 = vmatmul.msk.f32.vlgmr.msrb.gmra.mxu3 %vm146_vm3, %v194_v56 }
 0x311   :  { %v218_v57 = vpop.f32.mrf.mxu3 }
 0x312   :  { %247 = vst.msk [vmem:[#allocation7] sm:$0xff] %vm83_vm1, %v218_v57 }
 0x31f   :  { %v244_v58 = vpop.f32.mrf.mxu3 }
 0x320   :  { %248 = vst.msk [vmem:[#allocation7 + $0x8] sm:$0xff] %vm83_vm1, %v244_v58 }
 0x321   :  { %261 = dma.vmem_to_hbm [thread:$0]  %s254_s22, 256, %s256_s25, [#allocation4], %s371_s17, %s371_s17, %s372_s18  }
 0x322   :  { %368 = dma.done.wait [#allocation4], 256  }
 0x323   :  { %369 = vsyncadd [#allocation4], 4294967040 }
 0x324   :  { %266 = vsyncpa [#allocation3], 1 }
 0x325   :  { %267 = vsyncpa [#allocation6], 1 }
 0x326   :  { %268 = vsyncpa [#allocation4], 1 }

</bundles_post_ra>
